<compile_context>
chip_gen: v7x
topology: tpu7x:2x2x1
jax: 0.10.0
libtpu: 0.0.40
codegen_flags: <defaults>
</compile_context>

<pallas_src>
import functools
import math

import jax
import jax.numpy as jnp
from jax.experimental import pallas as pl
from jax.experimental.pallas import tpu as pltpu


def _round_up(x, m):
    return ((x + m - 1) // m) * m


def _glow_loss_kernel(out_ref, sldj_ref, ll_ref, acc_ref, *, n_features):
    # out_ref:  [TB, TD] (input dtype) VMEM tile of the flattened activations
    # sldj_ref: [TB, 1]  f32 VMEM (constant along the feature-tile axis)
    # ll_ref:   [TB, 1]  f32 VMEM output (per-row log-likelihood)
    # acc_ref:  [TB, 1]  f32 VMEM scratch (running sum of squares)
    d = pl.program_id(1)

    @pl.when(d == 0)
    def _():
        acc_ref[...] = jnp.zeros_like(acc_ref)

    x = out_ref[...].astype(jnp.float32)
    acc_ref[...] += jnp.sum(x * x, axis=-1, keepdims=True)

    @pl.when(d == pl.num_programs(1) - 1)
    def _():
        const = (0.5 * math.log(2.0 * math.pi) + math.log(256.0)) * n_features
        prior_ll = -0.5 * acc_ref[...] - const
        ll_ref[...] = prior_ll + sldj_ref[...].astype(jnp.float32)


def glow_loss(out, sldj):
    """out: [B, C, H, W], sldj: [B]  ->  scalar nll (float32)."""
    B, C, H, W = out.shape
    D = C * H * W
    denom = float(W) ** 2 * float(C)

    # Tile sizes: feature tiles are multiples of 128 lanes (<= 2048 to keep
    # double-buffered blocks ~<= 2 MiB each, safe for v7x's smaller VMEM);
    # batch tiles are multiples of 8 sublanes (<= 256 rows).
    TD = min(2048, _round_up(D, 128))
    D_pad = _round_up(D, TD)
    TB = min(256, _round_up(B, 8))
    B_pad = _round_up(B, TB)

    out_flat = out.reshape(B, D)
    if D_pad != D or B_pad != B:
        # Zero padding is exact: zeros contribute 0 to the sum of squares,
        # and padded batch rows are dropped in the epilogue below.
        out_flat = jnp.pad(out_flat, ((0, B_pad - B), (0, D_pad - D)))
    sldj2d = sldj.reshape(B, 1).astype(jnp.float32)
    if B_pad != B:
        sldj2d = jnp.pad(sldj2d, ((0, B_pad - B), (0, 0)))

    n_b = B_pad // TB
    n_d = D_pad // TD

    kernel = functools.partial(_glow_loss_kernel, n_features=D)

    cost = pl.CostEstimate(
        flops=2 * B_pad * D_pad,
        transcendentals=0,
        bytes_accessed=int(B_pad * D_pad * out_flat.dtype.itemsize + B_pad * 8),
    )

    ll = pl.pallas_call(
        kernel,
        out_shape=jax.ShapeDtypeStruct((B_pad, 1), jnp.float32),
        grid_spec=pltpu.PrefetchScalarGridSpec(
            num_scalar_prefetch=0,
            grid=(n_b, n_d),
            in_specs=[
                pl.BlockSpec((TB, TD), lambda b, d: (b, d)),
                pl.BlockSpec((TB, 1), lambda b, d: (b, 0)),
            ],
            out_specs=pl.BlockSpec((TB, 1), lambda b, d: (b, 0)),
            scratch_shapes=[pltpu.VMEM((TB, 1), jnp.float32)],
        ),
        compiler_params=pltpu.CompilerParams(
            dimension_semantics=("parallel", "arbitrary"),
        ),
        cost_estimate=cost,
    )(out_flat, sldj2d)

    # Epilogue: drop padded rows, mean over the true batch, final scale.
    ll_valid = ll[:B, 0]
    return -jnp.mean(ll_valid) / denom


def glow_loss_ref(out, sldj):
    B = out.shape[0]
    prior_ll = -0.5 * (out.astype(jnp.float32) ** 2 + math.log(2 * math.pi))
    prior_ll = prior_ll.reshape(B, -1).sum(-1) - math.log(256.0) * (
        out.shape[1] * out.shape[2] * out.shape[3]
    )
    ll = prior_ll + sldj.astype(jnp.float32)
    return -ll.mean() / out.shape[-1] ** 2 / out.shape[1]


if __name__ == "__main__":
    key = jax.random.PRNGKey(0)
    k1, k2, k3, k4 = jax.random.split(key, 4)

    # Case 1: aligned shapes (D = 1024, single feature tile).
    B, C, H, W = 2, 4, 16, 16
    out = jax.random.normal(k1, (B, C, H, W), dtype=jnp.float32)
    sldj = jax.random.normal(k2, (B,), dtype=jnp.float32) * 10.0
    nll = jax.block_until_ready(glow_loss(out, sldj))
    ref = jax.block_until_ready(glow_loss_ref(out, sldj))
    assert jnp.allclose(nll, ref, rtol=1e-5, atol=1e-5), (nll, ref)

    # Case 2: ragged shapes (B, D not multiples of 8 / 128) exercising padding.
    B2, C2, H2, W2 = 3, 3, 7, 5
    out2 = jax.random.normal(k3, (B2, C2, H2, W2), dtype=jnp.float32)
    sldj2 = jax.random.normal(k4, (B2,), dtype=jnp.float32) * 10.0
    nll2 = jax.block_until_ready(glow_loss(out2, sldj2))
    ref2 = jax.block_until_ready(glow_loss_ref(out2, sldj2))
    assert jnp.allclose(nll2, ref2, rtol=1e-5, atol=1e-5), (nll2, ref2)

    print("KERNEL_OK")
</pallas_src>

<mosaic_0001>
module attributes {stable_mosaic.version = 11 : i64} {
  func.func @_glow_loss_kernel(%arg0: i32, %arg1: i32, %arg2: memref<8x1024xf32, #tpu.memory_space<vmem>>, %arg3: memref<8x1xf32, #tpu.memory_space<vmem>>, %arg4: memref<8x1xf32, #tpu.memory_space<vmem>>, %arg5: memref<8x1xf32, #tpu.memory_space<vmem>>) attributes {dimension_semantics = [#tpu.dimension_semantics<parallel>, #tpu.dimension_semantics<arbitrary>], iteration_bounds = array<i64: 1, 1>, scalar_prefetch = 0 : i64, scratch_operands = 1 : i64, tpu.core_type = #tpu.core_type<tc>, window_params = [{transform_indices = @transform_0, window_bounds = array<i64: 8, 1024>}, {transform_indices = @transform_1, window_bounds = array<i64: 8, 1>}, {transform_indices = @transform_2, window_bounds = array<i64: 8, 1>}]} {
    %c0_i32 = arith.constant 0 : i32
    %0 = arith.cmpi eq, %arg1, %c0_i32 : i32
    %1 = arith.extui %0 : i1 to i32
    %c0_i32_0 = arith.constant 0 : i32
    %2 = arith.cmpi ne, %1, %c0_i32_0 : i32
    scf.if %2 {
      %cst_8 = arith.constant 0.000000e+00 : f32
      %13 = vector.broadcast %cst_8 : f32 to vector<8x1xf32>
      %c0_9 = arith.constant 0 : index
      %c0_10 = arith.constant 0 : index
      %14 = vector.load %arg5[%c0_9, %c0_10] : memref<8x1xf32, #tpu.memory_space<vmem>>, vector<8x1xf32>
      tpu.vector_store %arg5[%c0_9, %c0_10], %13 {strides = array<i32>} : memref<8x1xf32, #tpu.memory_space<vmem>>, vector<8x1xf32>,
    } else {
    }
    %c0 = arith.constant 0 : index
    %c0_1 = arith.constant 0 : index
    %3 = vector.load %arg2[%c0, %c0_1] : memref<8x1024xf32, #tpu.memory_space<vmem>>, vector<8x1024xf32>
    %c0_2 = arith.constant 0 : index
    %c0_3 = arith.constant 0 : index
    %4 = vector.load %arg5[%c0_2, %c0_3] : memref<8x1xf32, #tpu.memory_space<vmem>>, vector<8x1xf32>
    %5 = arith.mulf %3, %3 : vector<8x1024xf32>
    %cst = arith.constant dense<0.000000e+00> : vector<8xf32>
    %6 = vector.multi_reduction <add>, %5, %cst [1] : vector<8x1024xf32> to vector<8xf32>
    %7 = vector.shape_cast %6 : vector<8xf32> to vector<8x1xf32>
    %8 = arith.addf %4, %7 : vector<8x1xf32>
    %c0_4 = arith.constant 0 : index
    %c0_5 = arith.constant 0 : index
    %9 = vector.load %arg5[%c0_4, %c0_5] : memref<8x1xf32, #tpu.memory_space<vmem>>, vector<8x1xf32>
    tpu.vector_store %arg5[%c0_4, %c0_5], %8 {strides = array<i32>} : memref<8x1xf32, #tpu.memory_space<vmem>>, vector<8x1xf32>,
    %c0_i32_6 = arith.constant 0 : i32
    %10 = arith.cmpi eq, %arg1, %c0_i32_6 : i32
    %11 = arith.extui %10 : i1 to i32
    %c0_i32_7 = arith.constant 0 : i32
    %12 = arith.cmpi ne, %11, %c0_i32_7 : i32
    scf.if %12 {
      %c0_8 = arith.constant 0 : index
      %c0_9 = arith.constant 0 : index
      %13 = vector.load %arg5[%c0_8, %c0_9] : memref<8x1xf32, #tpu.memory_space<vmem>>, vector<8x1xf32>
      %cst_10 = arith.constant -5.000000e-01 : f32
      %14 = vector.broadcast %cst_10 : f32 to vector<8x1xf32>
      %15 = arith.mulf %14, %13 : vector<8x1xf32>
      %cst_11 = arith.constant 6619.25488 : f32
      %16 = vector.broadcast %cst_11 : f32 to vector<8x1xf32>
      %17 = arith.subf %15, %16 : vector<8x1xf32>
      %c0_12 = arith.constant 0 : index
      %c0_13 = arith.constant 0 : index
      %18 = vector.load %arg3[%c0_12, %c0_13] : memref<8x1xf32, #tpu.memory_space<vmem>>, vector<8x1xf32>
      %19 = arith.addf %17, %18 : vector<8x1xf32>
      %c0_14 = arith.constant 0 : index
      %c0_15 = arith.constant 0 : index
      %20 = vector.load %arg4[%c0_14, %c0_15] : memref<8x1xf32, #tpu.memory_space<vmem>>, vector<8x1xf32>
      tpu.vector_store %arg4[%c0_14, %c0_15], %19 {strides = array<i32>} : memref<8x1xf32, #tpu.memory_space<vmem>>, vector<8x1xf32>,
    } else {
    }
    return
  }
  func.func @transform_0(%arg0: i32, %arg1: i32) -> (i32, i32) {
    %c0_i32 = arith.constant 0 : i32
    return %arg0, %arg1 : i32, i32
  }
  func.func @transform_1(%arg0: i32, %arg1: i32) -> (i32, i32) {
    %c0_i32 = arith.constant 0 : i32
    %c0_i32_0 = arith.constant 0 : i32
    return %arg0, %c0_i32 : i32, i32
  }
  func.func @transform_2(%arg0: i32, %arg1: i32) -> (i32, i32) {
    %c0_i32 = arith.constant 0 : i32
    %c0_i32_0 = arith.constant 0 : i32
    return %arg0, %c0_i32 : i32, i32
  }
}

</mosaic_0001>

<bundles_post_ra>
// kernel: tpu_custom_call.1
= control target key start
LH: loop header
LB: loop body
LE: loop exit
PB: predicated region body
PF: predicated region fallthrough
CT: control target
= control target key end

     0   :  { %7 = vsyncpa [#allocation4], 0  ;;  %s99_s9 = smov [#allocation3]   ;;  %s137_s0 = inlined_call_operand.hbm [shape: f32[8,1024], index: 0, kind: input, shape index: {}]   ;;  %s138_s1 = inlined_call_operand.vmem [shape: f32[8,1], index: 1, kind: input, shape index: {}]   ;;  %s139_s2 = inlined_call_operand.vmem [shape: f32[8,1], index: 2, kind: output, shape index: {}]  }
   0x1   :  { %s14_s10 = sshll.u32 %s99_s9, 4  ;;  %s75_s13 = scalar_lea.hbm %s137_s0, 1024  ;;  %s15_s10 = int_to_ptr.vmem [resolvable:$true] %s14_s10 }
   0x2   :  { %p76_p0 = scmp.ne.s32.totalorder %s137_s0, %s75_s13  ;;  %p79_p1 = scmp.lt.u32.totalorder %s75_s13, %s137_s0 }
   0x4   :  { %p81_p2 = pnand %p79_p1, %p76_p0 }
   0x6   :  { %84 = shalt.err (!%p81_p2)
}
   0x7   :  { %s85_s18 = scalar_lea.vmem %s15_s10, 1024  ;;  %p90_p4 = scmp.lt.s32.totalorder %s15_s10, %s15_s10 }
   0x8   :  { %p86_p3 = scmp.ne.s32.totalorder %s15_s10, %s85_s18  ;;  %p91_p5 = scmp.lt.s32.totalorder %s85_s18, %s85_s18 }
   0xa   :  { %p92_p6 = por %p91_p5, %p90_p4 }
   0xc   :  { %p93_p7 = pnand %p92_p6, %p86_p3 }
   0xe   :  { %96 = shalt.err (!%p93_p7)
}
   0xf   :  { %17 = dma.hbm_to_vmem [thread:$0]  %s137_s0, 1024, %s15_s10, [#allocation4]  }
  0x10   :  { %97 = dma.done.wait [#allocation4], 1024  }
  0x11   :  { %98 = vsyncadd [#allocation4], 4294966272  ;;  %vm27_vm0 = vcmask 7168   ;;  %v100_v0 = vmov 0.0   ;;  %v29_v1 = vld [vmem:[#allocation3] sm:$0xff]  ;;  %v30_v2 = vld [vmem:[#allocation3 + $0x8] sm:$0xff] }
  0x12   :  { %28 = vst.msk [vmem:[#allocation2] sm:$0xff] %vm27_vm0, %v100_v0  ;;  %v31_v3 = vld [vmem:[#allocation3 + $0x10] sm:$0xff]  ;;  %v32_v4 = vld [vmem:[#allocation3 + $0x18] sm:$0xff]  ;;  %v38_v5 = vmul.f32 %v29_v1, %v29_v1  ;;  %v39_v6 = vmul.f32 %v30_v2, %v30_v2  ;;  %v33_v8 = vld [vmem:[#allocation3 + $0x20] sm:$0xff] }
  0x13   :  { %v40_v7 = vmul.f32 %v31_v3, %v31_v3  ;;  %v41_v9 = vmul.f32 %v32_v4, %v32_v4  ;;  %v34_v11 = vld [vmem:[#allocation3 + $0x28] sm:$0xff]  ;;  %v42_v12 = vmul.f32 %v33_v8, %v33_v8  ;;  %v35_v14 = vld [vmem:[#allocation3 + $0x30] sm:$0xff]  ;;  %v36_v17 = vld [vmem:[#allocation3 + $0x38] sm:$0xff] }
  0x14   :  { %v46_v10 = vadd.f32 %v39_v6, %v38_v5  ;;  %v43_v15 = vmul.f32 %v34_v11, %v34_v11  ;;  %v44_v18 = vmul.f32 %v35_v14, %v35_v14  ;;  %v45_v20 = vmul.f32 %v36_v17, %v36_v17  ;;  %v64_v29 = vld [vmem:[%s138_s1] sm:$0xff] }
  0x16   :  { %v47_v13 = vadd.f32 %v46_v10, %v40_v7 }
  0x18   :  { %v48_v16 = vadd.f32 %v47_v13, %v41_v9 }
  0x19   :  { %v37_v24 = vld [vmem:[#allocation2] sm:$0xff] }
  0x1a   :  { %v49_v19 = vadd.f32 %v48_v16, %v42_v12 }
  0x1c   :  { %v50_v21 = vadd.f32 %v49_v19, %v43_v15 }
  0x1e   :  { %v51_v22 = vadd.f32 %v50_v21, %v44_v18 }
  0x20   :  { %v52_v23 = vadd.f32 %v51_v22, %v45_v20 }
  0x22   :  { %53 = vadd.xlane.f32.xlu0 %v52_v23 }
  0xaf   :  { %v54_v25 = vpop.xlane.xlu0 %53 }
  0xb0   :  { %v55_v26 = vadd.f32 %v54_v25, %v37_v24 }
  0xb2   :  { %57 = vst.msk [vmem:[#allocation2] sm:$0xff] %vm27_vm0, %v55_v26 }
  0xb9   :  { %v61_v27 = vld [vmem:[#allocation2] sm:$0xff] }
  0xba   :  { %v62_v28 = vmul.f32 -0.5, %v61_v27 }
  0xbc   :  { %v72_v30 = vadd.f32 -6619.255, %v62_v28 }
  0xbe   :  { %v65_v31 = vadd.f32 %v72_v30, %v64_v29 }
  0xc0   :  { %66 = vst.msk [vmem:[%s139_s2] sm:$0xff] %vm27_vm0, %v65_v31 }
  0xc1   :  { %71 = vsyncpa [#allocation4], 1 }

</bundles_post_ra>
